<compile_context>
chip_gen: v6e
topology: v6e:2x2x1
jax: 0.10.0
libtpu: 0.0.40
codegen_flags: <defaults>
</compile_context>

<pallas_src>
import numpy as np
import jax
import jax.numpy as jnp
from jax import lax
from jax.experimental import pallas as pl
from jax.experimental.pallas import tpu as pltpu


def _round_up(a, b):
    return (a + b - 1) // b * b


def _shconv3d_kernel(xcol_ref, keff_ref, bias_ref, out_ref):
    """Fused real+imag SH-conv GEMM for one (batch, spatial-tile) grid step.

    xcol_ref : (S_TILE, CK3p)   zero-padded im2col patches
    keff_ref : (CK3p, 2N)       fused [real | imag] SH filter weights, N = F*H_sh,
                                column n = ri*N + f*H_sh + sh; central 1x1-conv weights
                                are pre-folded into the center-tap rows (real, sh==0 cols)
    bias_ref : (1, 2N)          central-conv bias scattered into (real, sh==0) columns
    out_ref  : (S_TILE, 2N)
    """
    acc = jnp.dot(xcol_ref[...], keff_ref[...], preferred_element_type=jnp.float32)
    out_ref[...] = (acc + bias_ref[...]).astype(out_ref.dtype)


def sh_conv3d_forward(x, atoms, w_param, wcp, bias, max_degree, *, s_tile=512):
    """Pallas SHConv3D.forward (padding='valid', stride=1).

    x       : (B, C, D, H, W) float32, NCDHW
    atoms   : (k, k, k, P, H_sh) complex64
    w_param : (1, 1, 1, 1, C, F, P, max_degree+1) float32
    wcp     : (F, C) float32   (torch Conv3d(in=C, out=F, k=1) weight, squeezed)
    bias    : (F,) float32
    returns : (real, imag), each (B, D', H', W', F, H_sh) float32
    """
    # TODO(synk): padding='same' / stride>1 variants are not implemented (module defaults used).
    B, C, D, H, W = x.shape
    k = atoms.shape[0]
    P = atoms.shape[3]
    Hsh = atoms.shape[4]
    F = w_param.shape[5]
    K3 = k ** 3
    crop = k // 2
    Do, Ho, Wo = D - 2 * crop, H - 2 * crop, W - 2 * crop
    S = Do * Ho * Wo
    N = F * Hsh                     # per-component output width (2N lane-dense when N=64)
    CK3 = C * K3
    CK3p = _round_up(CK3, 128)      # MXU-aligned contraction depth (zero-padded rows)
    S_TILE = min(s_tile, _round_up(S, 8))
    S_pad = _round_up(S, S_TILE)

    # ---- glue: im2col (pure data movement; all GEMM FLOPs run in the kernel) ----
    # TODO(synk): for large volumes replace host-side im2col with in-kernel halo-slab DMA
    # (x kept in HBM via memory_space=pl.ANY + make_async_copy) to avoid the K^3 HBM inflation.
    offsets = [(kd, kh, kw) for kd in range(k) for kh in range(k) for kw in range(k)]
    patches = jnp.stack(
        [x[:, :, kd:kd + Do, kh:kh + Ho, kw:kw + Wo] for (kd, kh, kw) in offsets],
        axis=2)                                               # (B, C, K3, Do, Ho, Wo)
    x_col = patches.reshape(B, CK3, S).transpose(0, 2, 1)     # (B, S, C*K3)
    x_col = jnp.pad(x_col, ((0, 0), (0, S_pad - S), (0, CK3p - CK3)))

    # ---- glue: weight preparation (repeat_interleave + fold p-sum + central conv fold) ----
    repeats = np.array([2 * n + 1 for n in range(max_degree + 1)])
    rep_idx = np.repeat(np.arange(max_degree + 1), repeats)            # (Hsh,)
    w_rep = jnp.squeeze(w_param, axis=(0, 1, 2, 3))[..., rep_idx]      # (C, F, P, Hsh)
    filt = atoms.reshape(K3, P, Hsh)
    # column order f*Hsh + sh -> output reshapes directly to (..., F, Hsh), no transpose
    keff_r = jnp.einsum('kps,cfps->ckfs', jnp.real(filt).astype(x.dtype), w_rep,
                        precision=lax.Precision.HIGHEST).reshape(CK3, N)
    keff_i = jnp.einsum('kps,cfps->ckfs', jnp.imag(filt).astype(x.dtype), w_rep,
                        precision=lax.Precision.HIGHEST).reshape(CK3, N)

    # fold the central-pixel 1x1 conv into the center-tap rows of the real block (sh==0 cols)
    center_tap = crop * k * k + crop * k + crop
    rows = np.arange(C) * K3 + center_tap                      # (C,)
    cols = np.arange(F) * Hsh                                  # (F,) -> sh == 0 columns
    keff_r = keff_r.at[rows[:, None], cols[None, :]].add(wcp.T.astype(x.dtype))

    keff = jnp.concatenate([keff_r, keff_i], axis=1)           # (CK3, 2N)
    keff = jnp.pad(keff, ((0, CK3p - CK3), (0, 0)))            # (CK3p, 2N)
    bias_wide = jnp.zeros((1, 2 * N), x.dtype).at[0, cols].set(bias.astype(x.dtype))

    grid = (B, S_pad // S_TILE)
    flops = 2 * B * S_pad * CK3p * (2 * N)
    bytes_accessed = 4 * (B * S_pad * (CK3p + 2 * N) + CK3p * 2 * N + 2 * N)

    grid_spec = pltpu.PrefetchScalarGridSpec(
        num_scalar_prefetch=0,
        grid=grid,
        in_specs=[
            pl.BlockSpec((None, S_TILE, CK3p), lambda b, s: (b, s, 0)),   # x_col (batch squeezed)
            pl.BlockSpec((CK3p, 2 * N), lambda b, s: (0, 0)),             # fused weights (resident)
            pl.BlockSpec((1, 2 * N), lambda b, s: (0, 0)),                # bias
        ],
        out_specs=pl.BlockSpec((None, S_TILE, 2 * N), lambda b, s: (b, s, 0)),
    )

    out = pl.pallas_call(
        _shconv3d_kernel,
        out_shape=jax.ShapeDtypeStruct((B, S_pad, 2 * N), x.dtype),
        grid_spec=grid_spec,
        compiler_params=pltpu.CompilerParams(
            dimension_semantics=("parallel", "parallel"),
            vmem_limit_bytes=32 * 1024 * 1024),
        cost_estimate=pl.CostEstimate(flops=flops, transcendentals=0,
                                      bytes_accessed=bytes_accessed),
    )(x_col, keff, bias_wide)

    out = out[:, :S, :].reshape(B, Do, Ho, Wo, 2, F, Hsh)
    real = out[:, :, :, :, 0]      # (B, D', H', W', F, Hsh)
    imag = out[:, :, :, :, 1]
    return real, imag


def _reference_forward(x, atoms, w_param, wcp, bias, max_degree):
    """Plain-JAX reference faithful to the PyTorch forward (for verification)."""
    B, C = x.shape[:2]
    k = atoms.shape[0]
    P = atoms.shape[3]
    Hsh = atoms.shape[4]
    F = w_param.shape[5]
    PH = P * Hsh

    filters = jnp.moveaxis(atoms.reshape(k, k, k, 1, PH), (3, 4), (1, 0))  # (PH,1,k,k,k)
    fr = jnp.real(filters).astype(x.dtype)
    fi = jnp.imag(filters).astype(x.dtype)
    dn = ('NCDHW', 'OIDHW', 'NCDHW')

    reals, imags = [], []
    for c in range(C):
        xc = x[:, c:c + 1]
        rc = lax.conv_general_dilated(xc, fr, (1, 1, 1), 'VALID',
                                      dimension_numbers=dn,
                                      precision=lax.Precision.HIGHEST)
        ic = lax.conv_general_dilated(xc, fi, (1, 1, 1), 'VALID',
                                      dimension_numbers=dn,
                                      precision=lax.Precision.HIGHEST)
        reals.append(jnp.moveaxis(rc, 1, -1))
        imags.append(jnp.moveaxis(ic, 1, -1))
    rfm = jnp.stack(reals, axis=4)   # (B, Do, Ho, Wo, C, PH)
    ifm = jnp.stack(imags, axis=4)
    Bo, Do, Ho, Wo = rfm.shape[:4]
    rfm = rfm.reshape(Bo, Do, Ho, Wo, C, 1, P, Hsh)
    ifm = ifm.reshape(Bo, Do, Ho, Wo, C, 1, P, Hsh)

    repeats = np.array([2 * n + 1 for n in range(max_degree + 1)])
    rep_idx = np.repeat(np.arange(max_degree + 1), repeats)
    w_rep = w_param[..., rep_idx]                              # (1,1,1,1,C,F,P,Hsh)

    real = jnp.sum(w_rep * rfm, axis=(4, 6))                   # (B, Do, Ho, Wo, F, Hsh)
    imag = jnp.sum(w_rep * ifm, axis=(4, 6))

    wcp5 = wcp.reshape(F, C, 1, 1, 1)
    cp = lax.conv_general_dilated(x, wcp5, (1, 1, 1), 'VALID',
                                  dimension_numbers=dn,
                                  precision=lax.Precision.HIGHEST)
    cp = cp + bias.reshape(1, F, 1, 1, 1)
    crop = k // 2
    cp = cp[:, :, crop:-crop, crop:-crop, crop:-crop]
    real = real.at[..., 0].add(jnp.moveaxis(cp, 1, -1))
    return real, imag


if __name__ == "__main__":
    key = jax.random.PRNGKey(0)
    k_ar, k_ai, k_w, k_cp, k_b, k_x = jax.random.split(key, 6)

    B, C_in, F_out = 2, 4, 4
    D = H = W = 12
    kernel_size = 3
    max_degree = 3
    n_harmonics = (max_degree + 1) ** 2   # 16
    n_radial_profiles = 2

    # TODO(synk): _atoms() is abstract in SHConv3D (subclasses build it from sympy Ynm);
    # here the complex SH atoms are synthetic but deterministic.
    atoms_shape = (kernel_size, kernel_size, kernel_size, n_radial_profiles, n_harmonics)
    atoms = (jax.random.normal(k_ar, atoms_shape, jnp.float32)
             + 1j * jax.random.normal(k_ai, atoms_shape, jnp.float32)).astype(jnp.complex64)

    limit = float(np.sqrt(6.0 / (C_in + F_out)))               # glorot_adapted
    w_param = jax.random.uniform(
        k_w, (1, 1, 1, 1, C_in, F_out, n_radial_profiles, max_degree + 1),
        jnp.float32, minval=-limit, maxval=limit)
    wcp = jax.random.uniform(k_cp, (F_out, C_in), jnp.float32, minval=-limit, maxval=limit)
    cp_bound = float(1.0 / np.sqrt(C_in))
    bias = jax.random.uniform(k_b, (F_out,), jnp.float32, minval=-cp_bound, maxval=cp_bound)

    x = jax.random.normal(k_x, (B, C_in, D, H, W), jnp.float32)

    real, imag = sh_conv3d_forward(x, atoms, w_param, wcp, bias, max_degree)
    jax.block_until_ready((real, imag))

    expected_shape = (B, D - 2, H - 2, W - 2, F_out, n_harmonics)
    assert real.shape == expected_shape and imag.shape == expected_shape

    ref_r, ref_i = _reference_forward(x, atoms, w_param, wcp, bias, max_degree)
    np.testing.assert_allclose(np.asarray(real), np.asarray(ref_r), rtol=2e-3, atol=2e-3)
    np.testing.assert_allclose(np.asarray(imag), np.asarray(ref_i), rtol=2e-3, atol=2e-3)

    print("KERNEL_OK")
</pallas_src>

<mosaic_0001>
module attributes {stable_mosaic.version = 11 : i64} {
  func.func @_shconv3d_kernel(%arg0: i32, %arg1: i32, %arg2: memref<1x512x128xf32, #tpu.memory_space<vmem>>, %arg3: memref<128x128xf32, #tpu.memory_space<vmem>>, %arg4: memref<1x128xf32, #tpu.memory_space<vmem>>, %arg5: memref<1x512x128xf32, #tpu.memory_space<vmem>>) attributes {dimension_semantics = [#tpu.dimension_semantics<parallel>, #tpu.dimension_semantics<parallel>], iteration_bounds = array<i64: 2, 2>, scalar_prefetch = 0 : i64, scratch_operands = 0 : i64, tpu.core_type = #tpu.core_type<tc>, window_params = [{transform_indices = @transform_0, window_bounds = array<i64: 1, 512, 128>}, {pipeline_mode = #tpu.pipeline_mode<synchronous>, transform_indices = @transform_1, window_bounds = array<i64: 128, 128>}, {pipeline_mode = #tpu.pipeline_mode<synchronous>, transform_indices = @transform_2, window_bounds = array<i64: 1, 128>}, {transform_indices = @transform_3, window_bounds = array<i64: 1, 512, 128>}]} {
    %c0 = arith.constant 0 : index
    %c0_0 = arith.constant 0 : index
    %c0_1 = arith.constant 0 : index
    %0 = vector.load %arg2[%c0, %c0_0, %c0_1] : memref<1x512x128xf32, #tpu.memory_space<vmem>>, vector<1x512x128xf32>
    %1 = vector.shape_cast %0 : vector<1x512x128xf32> to vector<512x128xf32>
    %c0_2 = arith.constant 0 : index
    %c0_3 = arith.constant 0 : index
    %2 = vector.load %arg3[%c0_2, %c0_3] : memref<128x128xf32, #tpu.memory_space<vmem>>, vector<128x128xf32>
    %cst = arith.constant dense<0.000000e+00> : vector<512x128xf32>
    %3 = tpu.matmul %1, %2, %cst {dimension_numbers = #tpu.dot_dimension_numbers<[1], [0], [0], [1], [0, 0, 1, 1], [], []>} : vector<512x128xf32>, vector<128x128xf32>, vector<512x128xf32> -> vector<512x128xf32>
    %c0_4 = arith.constant 0 : index
    %c0_5 = arith.constant 0 : index
    %4 = vector.load %arg4[%c0_4, %c0_5] : memref<1x128xf32, #tpu.memory_space<vmem>>, vector<1x128xf32>
    %5 = vector.broadcast %4 : vector<1x128xf32> to vector<512x128xf32>
    %6 = arith.addf %3, %5 : vector<512x128xf32>
    %c0_6 = arith.constant 0 : index
    %c0_7 = arith.constant 0 : index
    %c0_8 = arith.constant 0 : index
    %7 = vector.load %arg5[%c0_6, %c0_7, %c0_8] : memref<1x512x128xf32, #tpu.memory_space<vmem>>, vector<1x512x128xf32>
    %8 = vector.shape_cast %7 : vector<1x512x128xf32> to vector<512x128xf32>
    %9 = vector.shape_cast %6 : vector<512x128xf32> to vector<1x512x128xf32>
    tpu.vector_store %arg5[%c0_6, %c0_7, %c0_8], %9 {strides = array<i32>} : memref<1x512x128xf32, #tpu.memory_space<vmem>>, vector<1x512x128xf32>,
    return
  }
  func.func @transform_0(%arg0: i32, %arg1: i32) -> (i32, i32, i32) {
    %c0_i32 = arith.constant 0 : i32
    %c0_i32_0 = arith.constant 0 : i32
    return %arg0, %arg1, %c0_i32 : i32, i32, i32
  }
  func.func @transform_1(%arg0: i32, %arg1: i32) -> (i32, i32) {
    %c0_i32 = arith.constant 0 : i32
    %c0_i32_0 = arith.constant 0 : i32
    %c0_i32_1 = arith.constant 0 : i32
    return %c0_i32, %c0_i32_0 : i32, i32
  }
  func.func @transform_2(%arg0: i32, %arg1: i32) -> (i32, i32) {
    %c0_i32 = arith.constant 0 : i32
    %c0_i32_0 = arith.constant 0 : i32
    %c0_i32_1 = arith.constant 0 : i32
    return %c0_i32, %c0_i32_0 : i32, i32
  }
  func.func @transform_3(%arg0: i32, %arg1: i32) -> (i32, i32, i32) {
    %c0_i32 = arith.constant 0 : i32
    %c0_i32_0 = arith.constant 0 : i32
    return %arg0, %arg1, %c0_i32 : i32, i32, i32
  }
}

</mosaic_0001>

<bundles_post_ra>
// kernel: tpu_custom_call.1
= control target key start
LH: loop header
LB: loop body
LE: loop exit
PB: predicated region body
PF: predicated region fallthrough
CT: control target
= control target key end

     0   :  { %s1821_s0 = inlined_call_operand.hbm [shape: f32[2,1024,128], index: 0, kind: input, shape index: {}]   ;;  %s1822_s1 = inlined_call_operand.hbm [shape: f32[128,128], index: 1, kind: input, shape index: {}]   ;;  %s1823_s2 = inlined_call_operand.vmem [shape: f32[1,128], index: 2, kind: input, shape index: {}]   ;;  %s1824_s3 = inlined_call_operand.hbm [shape: f32[2,1024,128], index: 3, kind: output, shape index: {}]  }
   0x1   :  { %1832 = sst [smem:[#allocation15_spill]] %s1822_s1 }
   0x2   :  { %8 = vsyncpa [#allocation3], 0 }
   0x3   :  { %10 = vsyncpa [#allocation3 + $0x1], 0 }
   0x4   :  { %11 = vsyncpa [#allocation6], 0 }
   0x5   :  { %12 = vsyncpa [#allocation4], 0 }
   0x6   :  { %14 = vsyncpa [#allocation4 + $0x1], 0  ;;  %s1412_s12 = smov 0   ;;  %s1414_s13 = smov 0  }
   0x7   :  { %s1416_s14 = smov 0   ;;  %s1418_s15 = smov 0  }
   0x8   :  { %s1420_s16 = smov 0   ;;  %s1422_s17 = smov 0  }
   0x9   :  { %s1424_s18 = smov 0   ;;  %s1426_s19 = smov 0  }
   0xa LB: > { %1833 = sst [smem:[#allocation11_spill]] %s1355_s12  ;;  %s876_s20 = sadd.s32 4294967295, %s1383_s19   ;;  %s1383_s19 = sphi %s1426_s19, %s20_s19   ;;  %s1379_s18 = sphi %s1424_s18, %s1858_s18   ;;  %s1375_s17 = sphi %s1422_s17, %s1853_s17   ;;  %s1371_s16 = sphi %s1420_s16, %s1857_s16   ;;  %s1367_s15 = sphi %s1418_s15, %s1852_s15   ;;  %s1363_s14 = sphi %s1416_s14, %s1856_s14   ;;  %s1359_s13 = sphi %s1414_s13, %s1855_s13   ;;  %s1355_s12 = sphi %s1412_s12, %s1854_s12  }
   0xb   : > { %1834 = sst [smem:[#allocation12_spill]] %s1375_s17  ;;  %s877_s21 = sadd.s32 4294967294, %s1383_s19  }
   0xc   : > { %p54_p0 = scmp.ne.s32.totalorder %s1359_s13, %s1355_s12  ;;  %p1456_p1 = scmp.eq.s32.totalorder %s876_s20, 0 }
   0xd   : > { %p1460_p2 = scmp.eq.s32.totalorder %s876_s20, 3  ;;  %p128_p3 = scmp.eq.s32.totalorder %s877_s21, 3 }
   0xe   : > { %p1466_p4 = por %p1456_p1, %p54_p0  ;;  %p878_p5 = scmp.ge.s32.totalorder %s1383_s19, 1 }
   0xf   : > { %p1471_p6 = por %p128_p3, %p54_p0  ;;  %p135_p7 = scmp.lt.s32.totalorder %s1383_s19, 5 }
  0x10   : > { %s1837_s24 = scalar_select %p1466_p4, 1, 0 }
  0x11   : > { %s1838_s25 = scalar_select %p1471_p6, 1, 0 }
  0x12   : > { %p1476_p8 = pnand %p878_p5, %p135_p7  ;;  %s1385_s27 = smov [#allocation5]  }
  0x13   : > { %1839 = sst [smem:[#allocation13_spill]] %s1838_s25  ;;  %s147_s28 = sshll.u32 %s1385_s27, 4  ;;  %s148_s28 = int_to_ptr.vmem [resolvable:$true] %s147_s28 }
  0x14   : > { %p1144_p9 = pneg %p1476_p8  ;;  %s1240_s29 = scalar_lea.vmem %s148_s28, 2048 }
  0x15   : > { %p1241_p12 = scmp.ne.s32.totalorder %s148_s28, %s1240_s29  ;;  %p1248_p3 = scmp.lt.s32.totalorder %s148_s28, %s148_s28 }
  0x16   : > { %p1145_p10 = pnand %p1144_p9, %p1456_p1  ;;  %p1249_p6 = scmp.lt.s32.totalorder %s1240_s29, %s1240_s29 }
  0x18   : > { %p1231_p11 = pneg %p1145_p10  ;;  %p1250_p4 = por %p1249_p6, %p1248_p3 }
  0x1a   : > { %p1243_p13 = pnand %p1241_p12, %p1231_p11 }
  0x1c   : > { %p1244_p0 = pneg %p1243_p13 }
  0x1e   : > { %p1251_p5 = pnand %p1250_p4, %p1244_p0 }
  0x20   : > { %1254 = shalt.err (!%p1251_p5)
}
  0x21   : > { %s1826_s30 = smov 128   ;;  %s1827_s4 = smov 8  }
  0x22   : > { %s1841_s1 = sld [smem:[#allocation15_spill]]  ;;  %s29_s7 = sadd.s32 1, %s1375_s17 }
  0x23   : > { %p30_p4 = scmp.ge.s32.totalorder %s29_s7, 2  ;;  %s32_s8 = sadd.s32 1, %s1379_s18 }
  0x24   : > { %s41_s9 = sadd.s32 1, %s1363_s14  ;;  %p48_p6 = scmp.ne.s32.totalorder %s1363_s14, %s1359_s13 }
  0x25   : > { %s1860_s7 = smov (%p30_p4, %s29_s7), 0  ;;  %s1862_s8 = smov (!%p30_p4, %s32_s8), %s1379_s18 }
  0x26   : > { %1842 = sst [smem:[#allocation14_spill]] %s1860_s7  ;;  %s37_s10 = ssub.s32 %s1375_s17, %s1860_s7 }
  0x27   : > { %p49_p7 = scmp.eq.s32.totalorder %s1383_s19, 0  ;;  %p34_p9 = scmp.ge.s32.totalorder %s1862_s8, 2 }
  0x28   : > { %1147 = dma.hbm_to_vmem [thread:$0]  (!%p1145_p10), %s1841_s1, 2048, %s148_s28, [#allocation6], %s1826_s30, %s1826_s30, %s1827_s4  }
  0x29   : > { %p1503_p11 = por %p1460_p2, %p48_p6  ;;  %p1507_p10 = por %p49_p7, %p48_p6 }
  0x2a   : > { %p1157_p12 = scmp.lt.s32.totalorder %s1383_s19, 4  ;;  %s1864_s8 = smov (%p34_p9, %s1862_s8), 0 }
  0x2b   : > { %s164_s21 = sand.u32 1, %s1363_s14   ;;  %s882_s27 = sshll.u32 %s1375_s17, 6 }
  0x2c   : > { %s36_s28 = ssub.s32 %s1379_s18, %s1864_s8  ;;  %s881_s5 = sshll.u32 %s164_s21, 9 }
  0x2d   : > { %s38_s29 = sor.u32 %s37_s10, %s36_s28  ;;  %s883_s23 = sshll.u32 %s1379_s18, 7 }
  0x2e   : > { %p39_p13 = scmp.eq.s32.totalorder %s38_s29, 0  ;;  %s168_s6 = scalar_lea.vmem [#allocation2], %s881_s5 }
  0x2f   : > { %s177_s30 = sshll.u32 %s168_s6, 4  ;;  %s174_s1 = sadd.s32 %s883_s23, %s882_s27  ;;  %s178_s30 = int_to_ptr.vmem [resolvable:$true] %s177_s30 }
  0x30   : > { %s1520_s4 = scalar_select %p39_p13, %s1363_s14, %s41_s9  }
  0x31   : > { %s884_s7 = sshll.u32 %s174_s1, 7  ;;  %p1526_p2 = pnand %p1157_p12, %p1507_p10 }
  0x32   : > { %s176_s10 = scalar_lea.hbm %s1821_s0, %s884_s7  ;;  %s165_s28 = scalar_lea.sflag [#allocation3], %s164_s21 }
  0x33   : > { %p1257_p0 = pneg %p1526_p2  ;;  %s1268_s29 = scalar_lea.vmem %s178_s30, 8192 }
  0x34   : > { %p1269_p3 = scmp.ne.s32.totalorder %s178_s30, %s1268_s29  ;;  %s1388_s9 = smov [#allocation2]  }
  0x35   : > { %s1273_s1 = sshll.u32 %s1388_s9, 4  ;;  %s1274_s1 = int_to_ptr.vmem [resolvable:$false] %s1273_s1 }
  0x36   : > { %p1271_p5 = pnand %p1269_p3, %p1257_p0  ;;  %s1275_s20 = scalar_lea.vmem %s1274_s1, 16384 }
  0x37   : > { %p1276_p6 = scmp.lt.s32.totalorder %s178_s30, %s1274_s1  ;;  %p1277_p7 = scmp.lt.s32.totalorder %s1275_s20, %s1268_s29 }
  0x38   : > { %p1272_p4 = pneg %p1271_p5 }
  0x39   : > { %p1278_p9 = por %p1277_p7, %p1276_p6 }
  0x3b   : > { %p1279_p10 = pnand %p1278_p9, %p1272_p4 }
  0x3d   : > { %1282 = shalt.err (!%p1279_p10)
}
  0x3e   : > { %s1846_s12 = smov 8   ;;  %s1847_s17 = smov 128  }
  0x3f   : > { %1151 = dma.hbm_to_vmem [thread:$0]  (!%p1526_p2), %s176_s10, 8192, %s178_s30, %s165_s28, %s1847_s17, %s1847_s17, %s1846_s12  }
  0x40   : > { %189 = sbr.rel (%p1476_p8) target bundleno = 377 (0x179), region = 32  ;;  %s1543_s7 = sand.u32 (!%p1476_p8), 1, %s1359_s13  }
  0x41   : > { %s886_s21 = sshll.u32 (!%p1476_p8), %s1543_s7, 9  ;;  %s192_s27 = scalar_lea.sflag (!%p1476_p8), [#allocation3], %s1543_s7 }
  0x42   : > { %s1549_s5 = scalar_lea.vmem (!%p1476_p8), [#allocation2], %s886_s21  ;;  %p1848_p12 = scmp.ne.s32.totalorder (!%p1476_p8), %s1837_s24, 0 }
  0x45   : > { %1342 = dma.done.wait (%p1848_p12), %s192_s27, 8192  }
  0x46   : > { %1344 = vsyncadd (%p1848_p12), %s192_s27, 4294959104 }
  0x47   : > { %1346 = dma.done.wait (%p1456_p1), [#allocation6], 2048  }
  0x48   : > { %1348 = vsyncadd (%p1456_p1), [#allocation6], 4294965248  ;;  %v303_v0 = vld [vmem:[#allocation5 + $0x78] sm:$0xff]  ;;  %v302_v1 = vld [vmem:[#allocation5 + $0x70] sm:$0xff]  ;;  %s1632_s25 = scalar_lea.vmem [#allocation7], %s886_s21  ;;  %s891_s26 = sshll.u32 %s1367_s15, 6 }
  0x49   : > { %976 = vmatprep.subr.mxu0 %v303_v0  ;;  %1104 = vmatprep.subr.mxu1 %v303_v0  ;;  %v301_v2 = vld [vmem:[#allocation5 + $0x68] sm:$0xff]  ;;  %v300_v3 = vld [vmem:[#allocation5 + $0x60] sm:$0xff]  ;;  %v299_v4 = vld [vmem:[#allocation5 + $0x58] sm:$0xff]  ;;  %s892_s30 = sshll.u32 %s1371_s16, 7  ;;  %s776_s16 = sshll.u32 %s1632_s25, 4  ;;  %s1762_s16 = int_to_ptr.vmem [resolvable:$true] %s776_s16 }
  0x4a   : > { %977 = vmatpush3.msra.mxu0 %v303_v0  ;;  %1120 = vmatpush3.msra.mxu1 %v303_v0  ;;  %v298_v5 = vld [vmem:[#allocation5 + $0x50] sm:$0xff]  ;;  %v297_v6 = vld [vmem:[#allocation5 + $0x48] sm:$0xff]  ;;  %v296_v7 = vld [vmem:[#allocation5 + $0x40] sm:$0xff]  ;;  %s773_s23 = sadd.s32 %s892_s30, %s891_s26  ;;  %s761_s29 = scalar_lea.sflag [#allocation4], %s1543_s7 }
  0x4b   : > { %978 = vmatprep.subr.mxu0 %v302_v1  ;;  %1105 = vmatprep.subr.mxu1 %v302_v1  ;;  %v295_v8 = vld [vmem:[#allocation5 + $0x38] sm:$0xff]  ;;  %v294_v9 = vld [vmem:[#allocation5 + $0x30] sm:$0xff]  ;;  %v293_v10 = vld [vmem:[#allocation5 + $0x28] sm:$0xff]  ;;  %s893_s15 = sshll.u32 %s773_s23, 7  ;;  %s1283_s9 = scalar_lea.vmem %s1762_s16, 8192 }
  0x4c   : > { %979 = vmatpush3.msra.mxu0 %v302_v1  ;;  %1121 = vmatpush3.msra.mxu1 %v302_v1  ;;  %v292_v11 = vld [vmem:[#allocation5 + $0x20] sm:$0xff]  ;;  %v291_v12 = vld [vmem:[#allocation5 + $0x18] sm:$0xff]  ;;  %v290_v13 = vld [vmem:[#allocation5 + $0x10] sm:$0xff]  ;;  %s1760_s28 = scalar_lea.hbm %s1824_s3, %s893_s15  ;;  %p1284_p1 = scmp.ne.s32.totalorder %s1762_s16, %s1283_s9 }
  0x4d   : > { %980 = vmatprep.subr.mxu0 %v301_v2  ;;  %1106 = vmatprep.subr.mxu1 %v301_v2  ;;  %v289_v14 = vld [vmem:[#allocation5 + $0x8] sm:$0xff]  ;;  %v288_v15 = vld [vmem:[#allocation5] sm:$0xff]  ;;  %v226_v20 = vld [vmem:[%s1549_s5 + $0x10] sm:$0xff]  ;;  %s1389_s1 = smov [#allocation7]  }
  0x4e   : > { %981 = vmatpush3.msra.mxu0 %v301_v2  ;;  %1122 = vmatpush3.msra.mxu1 %v301_v2  ;;  %v224_v16 = vld [vmem:[%s1549_s5] sm:$0xff]  ;;  %v225_v18 = vld [vmem:[%s1549_s5 + $0x8] sm:$0xff]  ;;  %v258_v21 = vld [vmem:[%s1549_s5 + $0x110] sm:$0xff]  ;;  %p1285_p8 = pnand %p1284_p1, %p1503_p11  ;;  %s1287_s20 = sshll.u32 %s1389_s1, 4  ;;  %s1288_s20 = int_to_ptr.vmem [resolvable:$false] %s1287_s20 }
  0x4f   : > { %982 = vmatprep.subr.mxu0 %v300_v3  ;;  %1107 = vmatprep.subr.mxu1 %v300_v3  ;;  %v256_v17 = vld [vmem:[%s1549_s5 + $0x100] sm:$0xff]  ;;  %v257_v19 = vld [vmem:[%s1549_s5 + $0x108] sm:$0xff]  ;;  %v227_v22 = vld [vmem:[%s1549_s5 + $0x18] sm:$0xff]  ;;  %s1289_s12 = scalar_lea.vmem %s1288_s20, 16384  ;;  %p1290_p2 = scmp.lt.s32.totalorder %s1762_s16, %s1288_s20 }
  0x50   : > { %983 = vmatpush3.msra.mxu0 %v300_v3  ;;  %1123 = vmatpush3.msra.mxu1 %v300_v3  ;;  %v259_v23 = vld [vmem:[%s1549_s5 + $0x118] sm:$0xff]  ;;  %v228_v24 = vld [vmem:[%s1549_s5 + $0x20] sm:$0xff]  ;;  %v229_v26 = vld [vmem:[%s1549_s5 + $0x28] sm:$0xff]  ;;  %p1286_p13 = pneg %p1285_p8  ;;  %p1291_p0 = scmp.lt.s32.totalorder %s1289_s12, %s1283_s9 }
  0x51   : > { %984 = vmatprep.subr.mxu0 %v299_v4  ;;  %1108 = vmatprep.subr.mxu1 %v299_v4  ;;  %v260_v25 = vld [vmem:[%s1549_s5 + $0x120] sm:$0xff]  ;;  %v261_v27 = vld [vmem:[%s1549_s5 + $0x128] sm:$0xff]  ;;  %v230_v28 = vld [vmem:[%s1549_s5 + $0x30] sm:$0xff] }
  0x52   : > { %985 = vmatpush3.msra.mxu0 %v299_v4  ;;  %1124 = vmatpush3.msra.mxu1 %v299_v4  ;;  %v262_v29 = vld [vmem:[%s1549_s5 + $0x130] sm:$0xff]  ;;  %v231_v30 = vld [vmem:[%s1549_s5 + $0x38] sm:$0xff]  ;;  %v232_v32 = vld [vmem:[%s1549_s5 + $0x40] sm:$0xff]  ;;  %p1292_p3 = por %p1291_p0, %p1290_p2 }
  0x53   : > { %986 = vmatprep.subr.mxu0 %v298_v5  ;;  %1109 = vmatprep.subr.mxu1 %v298_v5  ;;  %v263_v31 = vld [vmem:[%s1549_s5 + $0x138] sm:$0xff]  ;;  %v264_v33 = vld [vmem:[%s1549_s5 + $0x140] sm:$0xff]  ;;  %v233_v34 = vld [vmem:[%s1549_s5 + $0x48] sm:$0xff] }
  0x54   : > { %987 = vmatpush3.msra.mxu0 %v298_v5  ;;  %1125 = vmatpush3.msra.mxu1 %v298_v5  ;;  %v265_v35 = vld [vmem:[%s1549_s5 + $0x148] sm:$0xff]  ;;  %v234_v36 = vld [vmem:[%s1549_s5 + $0x50] sm:$0xff]  ;;  %v235_v38 = vld [vmem:[%s1549_s5 + $0x58] sm:$0xff]  ;;  %p1293_p5 = pnand %p1292_p3, %p1286_p13 }
  0x55   : > { %988 = vmatprep.subr.mxu0 %v297_v6  ;;  %1110 = vmatprep.subr.mxu1 %v297_v6  ;;  %v266_v37 = vld [vmem:[%s1549_s5 + $0x150] sm:$0xff]  ;;  %v267_v39 = vld [vmem:[%s1549_s5 + $0x158] sm:$0xff]  ;;  %v236_v40 = vld [vmem:[%s1549_s5 + $0x60] sm:$0xff] }
  0x56   : > { %989 = vmatpush3.msra.mxu0 %v297_v6  ;;  %1126 = vmatpush3.msra.mxu1 %v297_v6  ;;  %v268_v41 = vld [vmem:[%s1549_s5 + $0x160] sm:$0xff]  ;;  %v237_v42 = vld [vmem:[%s1549_s5 + $0x68] sm:$0xff]  ;;  %v238_v44 = vld [vmem:[%s1549_s5 + $0x70] sm:$0xff] }
  0x57   : > { %990 = vmatprep.subr.mxu0 %v296_v7  ;;  %1111 = vmatprep.subr.mxu1 %v296_v7  ;;  %v269_v43 = vld [vmem:[%s1549_s5 + $0x168] sm:$0xff]  ;;  %v270_v45 = vld [vmem:[%s1549_s5 + $0x170] sm:$0xff]  ;;  %v239_v46 = vld [vmem:[%s1549_s5 + $0x78] sm:$0xff] }
  0x58   : > { %991 = vmatpush3.msra.mxu0 %v296_v7  ;;  %1127 = vmatpush3.msra.mxu1 %v296_v7  ;;  %v271_v47 = vld [vmem:[%s1549_s5 + $0x178] sm:$0xff]  ;;  %v240_v48 = vld [vmem:[%s1549_s5 + $0x80] sm:$0xff]  ;;  %v241_v50 = vld [vmem:[%s1549_s5 + $0x88] sm:$0xff] }
  0x59   : > { %992 = vmatprep.subr.mxu0 %v295_v8  ;;  %1112 = vmatprep.subr.mxu1 %v295_v8  ;;  %v272_v49 = vld [vmem:[%s1549_s5 + $0x180] sm:$0xff]  ;;  %v273_v51 = vld [vmem:[%s1549_s5 + $0x188] sm:$0xff]  ;;  %v242_v52 = vld [vmem:[%s1549_s5 + $0x90] sm:$0xff] }
  0x5a   : > { %993 = vmatpush3.msra.mxu0 %v295_v8  ;;  %1128 = vmatpush3.msra.mxu1 %v295_v8  ;;  %v274_v53 = vld [vmem:[%s1549_s5 + $0x190] sm:$0xff]  ;;  %v243_v54 = vld [vmem:[%s1549_s5 + $0x98] sm:$0xff]  ;;  %v244_v56 = vld [vmem:[%s1549_s5 + $0xa0] sm:$0xff] }
  0x5b   : > { %994 = vmatprep.subr.mxu0 %v294_v9  ;;  %1113 = vmatprep.subr.mxu1 %v294_v9  ;;  %v275_v55 = vld [vmem:[%s1549_s5 + $0x198] sm:$0xff]  ;;  %v276_v57 = vld [vmem:[%s1549_s5 + $0x1a0] sm:$0xff]  ;;  %v245_v58 = vld [vmem:[%s1549_s5 + $0xa8] sm:$0xff] }
  0x5c   : > { %995 = vmatpush3.msra.mxu0 %v294_v9  ;;  %1129 = vmatpush3.msra.mxu1 %v294_v9  ;;  %v277_v59 = vld [vmem:[%s1549_s5 + $0x1a8] sm:$0xff]  ;;  %v246_v60 = vld [vmem:[%s1549_s5 + $0xb0] sm:$0xff]  ;;  %v247_v62 = vld [vmem:[%s1549_s5 + $0xb8] sm:$0xff] }
  0x5d   : > { %996 = vmatprep.subr.mxu0 %v293_v10  ;;  %1114 = vmatprep.subr.mxu1 %v293_v10  ;;  %v278_v61 = vld [vmem:[%s1549_s5 + $0x1b0] sm:$0xff]  ;;  %v279_v63 = vld [vmem:[%s1549_s5 + $0x1b8] sm:$0xff]  ;;  %v248_v0 = vld [vmem:[%s1549_s5 + $0xc0] sm:$0xff] }
  0x5e   : > { %997 = vmatpush3.msra.mxu0 %v293_v10  ;;  %1130 = vmatpush3.msra.mxu1 %v293_v10  ;;  %v280_v1 = vld [vmem:[%s1549_s5 + $0x1c0] sm:$0xff]  ;;  %v249_v2 = vld [vmem:[%s1549_s5 + $0xc8] sm:$0xff]  ;;  %v250_v4 = vld [vmem:[%s1549_s5 + $0xd0] sm:$0xff] }
  0x5f   : > { %998 = vmatprep.subr.mxu0 %v292_v11  ;;  %1115 = vmatprep.subr.mxu1 %v292_v11  ;;  %v281_v3 = vld [vmem:[%s1549_s5 + $0x1c8] sm:$0xff]  ;;  %v282_v5 = vld [vmem:[%s1549_s5 + $0x1d0] sm:$0xff]  ;;  %v251_v6 = vld [vmem:[%s1549_s5 + $0xd8] sm:$0xff] }
  0x60   : > { %999 = vmatpush3.msra.mxu0 %v292_v11  ;;  %1131 = vmatpush3.msra.mxu1 %v292_v11  ;;  %v283_v7 = vld [vmem:[%s1549_s5 + $0x1d8] sm:$0xff]  ;;  %v252_v8 = vld [vmem:[%s1549_s5 + $0xe0] sm:$0xff]  ;;  %v253_v10 = vld [vmem:[%s1549_s5 + $0xe8] sm:$0xff] }
  0x61   : > { %1000 = vmatprep.subr.mxu0 %v291_v12  ;;  %1116 = vmatprep.subr.mxu1 %v291_v12  ;;  %v284_v9 = vld [vmem:[%s1549_s5 + $0x1e0] sm:$0xff]  ;;  %v285_v11 = vld [vmem:[%s1549_s5 + $0x1e8] sm:$0xff] }
  0x62   : > { %1001 = vmatpush3.msra.mxu0 %v291_v12  ;;  %1132 = vmatpush3.msra.mxu1 %v291_v12  ;;  %v254_v12 = vld [vmem:[%s1549_s5 + $0xf0] sm:$0xff] }
  0x63   : > { %1002 = vmatprep.subr.mxu0 %v290_v13  ;;  %1117 = vmatprep.subr.mxu1 %v290_v13 }
  0x64   : > { %1003 = vmatpush3.msra.mxu0 %v290_v13  ;;  %1133 = vmatpush3.msra.mxu1 %v290_v13  ;;  %v286_v13 = vld [vmem:[%s1549_s5 + $0x1f0] sm:$0xff] }
  0x65   : > { %1004 = vmatprep.subr.mxu0 %v289_v14  ;;  %1118 = vmatprep.subr.mxu1 %v289_v14 }
  0x66   : > { %1005 = vmatpush3.msra.mxu0 %v289_v14  ;;  %1134 = vmatpush3.msra.mxu1 %v289_v14  ;;  %v255_v14 = vld [vmem:[%s1549_s5 + $0xf8] sm:$0xff] }
  0x67   : > { %1006 = vmatprep.subr.mxu0 %v288_v15  ;;  %1119 = vmatprep.subr.mxu1 %v288_v15 }
  0x68   : > { %1007 = vmatpush3.msra.mxu0 %v288_v15  ;;  %1135 = vmatpush3.msra.mxu1 %v288_v15  ;;  %v287_v15 = vld [vmem:[%s1549_s5 + $0x1f8] sm:$0xff] }
  0x69   : > { %1008 = vmatprep.mubr.f32.mxu0 %v224_v16  ;;  %1056 = vmatprep.mubr.f32.mxu1 %v256_v17  ;;  %v1626_v16 = vld [vmem:[%s1823_s2] ss:$0 sm:$0xff] }
  0x6a   : > { %1009 = vmatmul.mubr.f32.vlgmr.msra.gmra.mxu0 %v225_v18  ;;  %1057 = vmatmul.mubr.f32.vlgmr.msra.gmra.mxu1 %v257_v19 }
  0x6b   : > { %1011 = vmatprep.mubr.f32.mxu0 %v226_v20  ;;  %1059 = vmatprep.mubr.f32.mxu1 %v258_v21 }
  0x6e   : > { %1012 = vmatmul.mubr.f32.gmra.mxu0 %v227_v22  ;;  %1060 = vmatmul.mubr.f32.gmra.mxu1 %v259_v23 }
  0x6f   : > { %1014 = vmatprep.mubr.f32.mxu0 %v228_v24  ;;  %1062 = vmatprep.mubr.f32.mxu1 %v260_v25 }
  0x72   : > { %1015 = vmatmul.mubr.f32.gmra.mxu0 %v229_v26  ;;  %1063 = vmatmul.mubr.f32.gmra.mxu1 %v261_v27 }
  0x73   : > { %1017 = vmatprep.mubr.f32.mxu0 %v230_v28  ;;  %1065 = vmatprep.mubr.f32.mxu1 %v262_v29 }
  0x76   : > { %1018 = vmatmul.mubr.f32.gmra.mxu0 %v231_v30  ;;  %1066 = vmatmul.mubr.f32.gmra.mxu1 %v263_v31 }
  0x77   : > { %1020 = vmatprep.mubr.f32.mxu0 %v232_v32  ;;  %1068 = vmatprep.mubr.f32.mxu1 %v264_v33 }
  0x7a   : > { %1021 = vmatmul.mubr.f32.gmra.mxu0 %v233_v34  ;;  %1069 = vmatmul.mubr.f32.gmra.mxu1 %v265_v35 }
  0x7b   : > { %1023 = vmatprep.mubr.f32.mxu0 %v234_v36  ;;  %1071 = vmatprep.mubr.f32.mxu1 %v266_v37 }
  0x7e   : > { %1024 = vmatmul.mubr.f32.gmra.mxu0 %v235_v38  ;;  %1072 = vmatmul.mubr.f32.gmra.mxu1 %v267_v39 }
  0x7f   : > { %1026 = vmatprep.mubr.f32.mxu0 %v236_v40  ;;  %1074 = vmatprep.mubr.f32.mxu1 %v268_v41 }
  0x82   : > { %1027 = vmatmul.mubr.f32.gmra.mxu0 %v237_v42  ;;  %1075 = vmatmul.mubr.f32.gmra.mxu1 %v269_v43 }
  0x83   : > { %1029 = vmatprep.mubr.f32.mxu0 %v238_v44  ;;  %1077 = vmatprep.mubr.f32.mxu1 %v270_v45 }
  0x86   : > { %1030 = vmatmul.mubr.f32.gmra.mxu0 %v239_v46  ;;  %1078 = vmatmul.mubr.f32.gmra.mxu1 %v271_v47 }
  0x87   : > { %1032 = vmatprep.mubr.f32.mxu0 %v240_v48  ;;  %1080 = vmatprep.mubr.f32.mxu1 %v272_v49 }
  0x8a   : > { %1033 = vmatmul.mubr.f32.gmra.mxu0 %v241_v50  ;;  %1081 = vmatmul.mubr.f32.gmra.mxu1 %v273_v51 }
  0x8b   : > { %1035 = vmatprep.mubr.f32.mxu0 %v242_v52  ;;  %1083 = vmatprep.mubr.f32.mxu1 %v274_v53 }
  0x8e   : > { %1036 = vmatmul.mubr.f32.gmra.mxu0 %v243_v54  ;;  %1084 = vmatmul.mubr.f32.gmra.mxu1 %v275_v55 }
  0x8f   : > { %1038 = vmatprep.mubr.f32.mxu0 %v244_v56  ;;  %1086 = vmatprep.mubr.f32.mxu1 %v276_v57 }
  0x92   : > { %1039 = vmatmul.mubr.f32.gmra.mxu0 %v245_v58  ;;  %1087 = vmatmul.mubr.f32.gmra.mxu1 %v277_v59 }
  0x93   : > { %1041 = vmatprep.mubr.f32.mxu0 %v246_v60  ;;  %1089 = vmatprep.mubr.f32.mxu1 %v278_v61 }
  0x96   : > { %1042 = vmatmul.mubr.f32.gmra.mxu0 %v247_v62  ;;  %1090 = vmatmul.mubr.f32.gmra.mxu1 %v279_v63 }
  0x97   : > { %1044 = vmatprep.mubr.f32.mxu0 %v248_v0  ;;  %1092 = vmatprep.mubr.f32.mxu1 %v280_v1 }
  0x9a   : > { %1045 = vmatmul.mubr.f32.gmra.mxu0 %v249_v2  ;;  %1093 = vmatmul.mubr.f32.gmra.mxu1 %v281_v3 }
  0x9b   : > { %1047 = vmatprep.mubr.f32.mxu0 %v250_v4  ;;  %1095 = vmatprep.mubr.f32.mxu1 %v282_v5 }
  0x9e   : > { %1048 = vmatmul.mubr.f32.gmra.mxu0 %v251_v6  ;;  %1096 = vmatmul.mubr.f32.gmra.mxu1 %v283_v7 }
  0x9f   : > { %1050 = vmatprep.mubr.f32.mxu0 %v252_v8  ;;  %1098 = vmatprep.mubr.f32.mxu1 %v284_v9 }
  0xa2   : > { %1051 = vmatmul.mubr.f32.gmra.mxu0 %v253_v10  ;;  %1099 = vmatmul.mubr.f32.gmra.mxu1 %v285_v11 }
  0xa3   : > { %1053 = vmatprep.mubr.f32.mxu0 %v254_v12  ;;  %1101 = vmatprep.mubr.f32.mxu1 %v286_v13 }
  0xa6   : > { %1054 = vmatmul.mubr.f32.gmra.mxu0 %v255_v14  ;;  %1102 = vmatmul.mubr.f32.gmra.mxu1 %v287_v15 }
 0x12a   : > { %v1010_v17 = vpop.f32.mrf.mxu0  ;;  %v1058_v18 = vpop.f32.mrf.mxu1 }
 0x12b   : > { %v383_v19 = vadd.f32 %v1010_v17, %v1626_v16  ;;  %v543_v20 = vadd.f32 %v1058_v18, %v1626_v16 }
 0x12c   : > { %v377_v21 = vpop.f32.mrf.mxu0  ;;  %v537_v22 = vpop.f32.mrf.mxu1 }
 0x12d   : > { %697 = vst [vmem:[%s1632_s25 + $0x8] sm:$0xff] %v383_v19  ;;  %729 = vst [vmem:[%s1632_s25 + $0x108] sm:$0xff] %v543_v20  ;;  %v378_v23 = vadd.f32 %v1626_v16, %v377_v21  ;;  %v538_v24 = vadd.f32 %v1626_v16, %v537_v22 }
 0x12e   : > { %v1013_v25 = vpop.f32.mrf.mxu0  ;;  %v1061_v26 = vpop.f32.mrf.mxu1 }
 0x12f   : > { %696 = vst [vmem:[%s1632_s25] sm:$0xff] %v378_v23  ;;  %728 = vst [vmem:[%s1632_s25 + $0x100] sm:$0xff] %v538_v24  ;;  %v393_v27 = vadd.f32 %v1013_v25, %v1626_v16  ;;  %v553_v28 = vadd.f32 %v1061_v26, %v1626_v16 }
 0x130   : > { %v387_v29 = vpop.f32.mrf.mxu0  ;;  %v547_v30 = vpop.f32.mrf.mxu1 }
 0x131   : > { %699 = vst [vmem:[%s1632_s25 + $0x18] sm:$0xff] %v393_v27  ;;  %731 = vst [vmem:[%s1632_s25 + $0x118] sm:$0xff] %v553_v28  ;;  %v388_v31 = vadd.f32 %v1626_v16, %v387_v29  ;;  %v548_v32 = vadd.f32 %v1626_v16, %v547_v30 }
 0x132   : > { %v1016_v33 = vpop.f32.mrf.mxu0  ;;  %v1064_v34 = vpop.f32.mrf.mxu1 }
 0x133   : > { %698 = vst [vmem:[%s1632_s25 + $0x10] sm:$0xff] %v388_v31  ;;  %730 = vst [vmem:[%s1632_s25 + $0x110] sm:$0xff] %v548_v32  ;;  %v403_v35 = vadd.f32 %v1016_v33, %v1626_v16  ;;  %v563_v36 = vadd.f32 %v1064_v34, %v1626_v16 }
 0x134   : > { %v397_v37 = vpop.f32.mrf.mxu0  ;;  %v557_v38 = vpop.f32.mrf.mxu1 }
 0x135   : > { %701 = vst [vmem:[%s1632_s25 + $0x28] sm:$0xff] %v403_v35  ;;  %733 = vst [vmem:[%s1632_s25 + $0x128] sm:$0xff] %v563_v36  ;;  %v398_v39 = vadd.f32 %v1626_v16, %v397_v37  ;;  %v558_v40 = vadd.f32 %v1626_v16, %v557_v38 }
 0x136   : > { %v1019_v41 = vpop.f32.mrf.mxu0  ;;  %v1067_v42 = vpop.f32.mrf.mxu1 }
 0x137   : > { %700 = vst [vmem:[%s1632_s25 + $0x20] sm:$0xff] %v398_v39  ;;  %732 = vst [vmem:[%s1632_s25 + $0x120] sm:$0xff] %v558_v40  ;;  %v413_v43 = vadd.f32 %v1019_v41, %v1626_v16  ;;  %v573_v44 = vadd.f32 %v1067_v42, %v1626_v16 }
 0x138   : > { %v407_v45 = vpop.f32.mrf.mxu0  ;;  %v567_v46 = vpop.f32.mrf.mxu1 }
 0x139   : > { %703 = vst [vmem:[%s1632_s25 + $0x38] sm:$0xff] %v413_v43  ;;  %735 = vst [vmem:[%s1632_s25 + $0x138] sm:$0xff] %v573_v44  ;;  %v408_v47 = vadd.f32 %v1626_v16, %v407_v45  ;;  %v568_v48 = vadd.f32 %v1626_v16, %v567_v46 }
 0x13a   : > { %v1022_v49 = vpop.f32.mrf.mxu0  ;;  %v1070_v50 = vpop.f32.mrf.mxu1 }
 0x13b   : > { %702 = vst [vmem:[%s1632_s25 + $0x30] sm:$0xff] %v408_v47  ;;  %734 = vst [vmem:[%s1632_s25 + $0x130] sm:$0xff] %v568_v48  ;;  %v423_v51 = vadd.f32 %v1022_v49, %v1626_v16  ;;  %v583_v52 = vadd.f32 %v1070_v50, %v1626_v16 }
 0x13c   : > { %v417_v53 = vpop.f32.mrf.mxu0  ;;  %v577_v54 = vpop.f32.mrf.mxu1 }
 0x13d   : > { %705 = vst [vmem:[%s1632_s25 + $0x48] sm:$0xff] %v423_v51  ;;  %737 = vst [vmem:[%s1632_s25 + $0x148] sm:$0xff] %v583_v52  ;;  %v418_v55 = vadd.f32 %v1626_v16, %v417_v53  ;;  %v578_v56 = vadd.f32 %v1626_v16, %v577_v54 }
 0x13e   : > { %v1025_v57 = vpop.f32.mrf.mxu0  ;;  %v1073_v58 = vpop.f32.mrf.mxu1 }
 0x13f   : > { %704 = vst [vmem:[%s1632_s25 + $0x40] sm:$0xff] %v418_v55  ;;  %736 = vst [vmem:[%s1632_s25 + $0x140] sm:$0xff] %v578_v56  ;;  %v433_v59 = vadd.f32 %v1025_v57, %v1626_v16  ;;  %v593_v60 = vadd.f32 %v1073_v58, %v1626_v16 }
 0x140   : > { %v427_v61 = vpop.f32.mrf.mxu0  ;;  %v587_v62 = vpop.f32.mrf.mxu1 }
 0x141   : > { %707 = vst [vmem:[%s1632_s25 + $0x58] sm:$0xff] %v433_v59  ;;  %739 = vst [vmem:[%s1632_s25 + $0x158] sm:$0xff] %v593_v60  ;;  %v428_v63 = vadd.f32 %v1626_v16, %v427_v61  ;;  %v588_v0 = vadd.f32 %v1626_v16, %v587_v62 }
 0x142   : > { %v1028_v1 = vpop.f32.mrf.mxu0  ;;  %v1076_v2 = vpop.f32.mrf.mxu1 }
 0x143   : > { %706 = vst [vmem:[%s1632_s25 + $0x50] sm:$0xff] %v428_v63  ;;  %738 = vst [vmem:[%s1632_s25 + $0x150] sm:$0xff] %v588_v0  ;;  %v443_v3 = vadd.f32 %v1028_v1, %v1626_v16  ;;  %v603_v4 = vadd.f32 %v1076_v2, %v1626_v16 }
 0x144   : > { %v437_v5 = vpop.f32.mrf.mxu0  ;;  %v597_v6 = vpop.f32.mrf.mxu1 }
 0x145   : > { %709 = vst [vmem:[%s1632_s25 + $0x68] sm:$0xff] %v443_v3  ;;  %741 = vst [vmem:[%s1632_s25 + $0x168] sm:$0xff] %v603_v4  ;;  %v438_v7 = vadd.f32 %v1626_v16, %v437_v5  ;;  %v598_v8 = vadd.f32 %v1626_v16, %v597_v6 }
 0x146   : > { %v1031_v9 = vpop.f32.mrf.mxu0  ;;  %v1079_v10 = vpop.f32.mrf.mxu1 }
 0x147   : > { %708 = vst [vmem:[%s1632_s25 + $0x60] sm:$0xff] %v438_v7  ;;  %740 = vst [vmem:[%s1632_s25 + $0x160] sm:$0xff] %v598_v8  ;;  %v453_v11 = vadd.f32 %v1031_v9, %v1626_v16  ;;  %v613_v12 = vadd.f32 %v1079_v10, %v1626_v16 }
 0x148   : > { %v447_v13 = vpop.f32.mrf.mxu0  ;;  %v607_v14 = vpop.f32.mrf.mxu1 }
 0x149   : > { %711 = vst [vmem:[%s1632_s25 + $0x78] sm:$0xff] %v453_v11  ;;  %743 = vst [vmem:[%s1632_s25 + $0x178] sm:$0xff] %v613_v12  ;;  %v448_v15 = vadd.f32 %v1626_v16, %v447_v13  ;;  %v608_v17 = vadd.f32 %v1626_v16, %v607_v14 }
 0x14a   : > { %v1034_v18 = vpop.f32.mrf.mxu0  ;;  %v1082_v19 = vpop.f32.mrf.mxu1 }
 0x14b   : > { %710 = vst [vmem:[%s1632_s25 + $0x70] sm:$0xff] %v448_v15  ;;  %742 = vst [vmem:[%s1632_s25 + $0x170] sm:$0xff] %v608_v17  ;;  %v463_v20 = vadd.f32 %v1034_v18, %v1626_v16  ;;  %v623_v21 = vadd.f32 %v1082_v19, %v1626_v16 }
 0x14c   : > { %v457_v22 = vpop.f32.mrf.mxu0  ;;  %v617_v23 = vpop.f32.mrf.mxu1 }
 0x14d   : > { %713 = vst [vmem:[%s1632_s25 + $0x88] sm:$0xff] %v463_v20  ;;  %745 = vst [vmem:[%s1632_s25 + $0x188] sm:$0xff] %v623_v21  ;;  %v458_v24 = vadd.f32 %v1626_v16, %v457_v22  ;;  %v618_v25 = vadd.f32 %v1626_v16, %v617_v23 }
 0x14e   : > { %v1037_v26 = vpop.f32.mrf.mxu0  ;;  %v1085_v27 = vpop.f32.mrf.mxu1 }
 0x14f   : > { %712 = vst [vmem:[%s1632_s25 + $0x80] sm:$0xff] %v458_v24  ;;  %744 = vst [vmem:[%s1632_s25 + $0x180] sm:$0xff] %v618_v25  ;;  %v473_v28 = vadd.f32 %v1037_v26, %v1626_v16  ;;  %v633_v29 = vadd.f32 %v1085_v27, %v1626_v16 }
 0x150   : > { %v467_v30 = vpop.f32.mrf.mxu0  ;;  %v627_v31 = vpop.f32.mrf.mxu1 }
 0x151   : > { %715 = vst [vmem:[%s1632_s25 + $0x98] sm:$0xff] %v473_v28  ;;  %747 = vst [vmem:[%s1632_s25 + $0x198] sm:$0xff] %v633_v29  ;;  %v468_v32 = vadd.f32 %v1626_v16, %v467_v30  ;;  %v628_v33 = vadd.f32 %v1626_v16, %v627_v31 }
 0x152   : > { %v1040_v34 = vpop.f32.mrf.mxu0  ;;  %v1088_v35 = vpop.f32.mrf.mxu1 }
 0x153   : > { %714 = vst [vmem:[%s1632_s25 + $0x90] sm:$0xff] %v468_v32  ;;  %746 = vst [vmem:[%s1632_s25 + $0x190] sm:$0xff] %v628_v33  ;;  %v483_v36 = vadd.f32 %v1040_v34, %v1626_v16  ;;  %v643_v37 = vadd.f32 %v1088_v35, %v1626_v16 }
 0x154   : > { %v477_v38 = vpop.f32.mrf.mxu0  ;;  %v637_v39 = vpop.f32.mrf.mxu1 }
 0x155   : > { %717 = vst [vmem:[%s1632_s25 + $0xa8] sm:$0xff] %v483_v36  ;;  %749 = vst [vmem:[%s1632_s25 + $0x1a8] sm:$0xff] %v643_v37  ;;  %v478_v40 = vadd.f32 %v1626_v16, %v477_v38  ;;  %v638_v41 = vadd.f32 %v1626_v16, %v637_v39 }
 0x156   : > { %v1043_v42 = vpop.f32.mrf.mxu0  ;;  %v1091_v43 = vpop.f32.mrf.mxu1 }
 0x157   : > { %716 = vst [vmem:[%s1632_s25 + $0xa0] sm:$0xff] %v478_v40  ;;  %748 = vst [vmem:[%s1632_s25 + $0x1a0] sm:$0xff] %v638_v41  ;;  %v493_v44 = vadd.f32 %v1043_v42, %v1626_v16  ;;  %v653_v45 = vadd.f32 %v1091_v43, %v1626_v16 }
 0x158   : > { %v487_v46 = vpop.f32.mrf.mxu0  ;;  %v647_v47 = vpop.f32.mrf.mxu1 }
 0x159   : > { %719 = vst [vmem:[%s1632_s25 + $0xb8] sm:$0xff] %v493_v44  ;;  %751 = vst [vmem:[%s1632_s25 + $0x1b8] sm:$0xff] %v653_v45  ;;  %v488_v48 = vadd.f32 %v1626_v16, %v487_v46  ;;  %v648_v49 = vadd.f32 %v1626_v16, %v647_v47 }
 0x15a   : > { %v1046_v50 = vpop.f32.mrf.mxu0  ;;  %v1094_v51 = vpop.f32.mrf.mxu1 }
 0x15b   : > { %718 = vst [vmem:[%s1632_s25 + $0xb0] sm:$0xff] %v488_v48  ;;  %750 = vst [vmem:[%s1632_s25 + $0x1b0] sm:$0xff] %v648_v49  ;;  %v503_v52 = vadd.f32 %v1046_v50, %v1626_v16  ;;  %v663_v53 = vadd.f32 %v1094_v51, %v1626_v16 }
 0x15c   : > { %v497_v54 = vpop.f32.mrf.mxu0  ;;  %v657_v55 = vpop.f32.mrf.mxu1 }
 0x15d   : > { %721 = vst [vmem:[%s1632_s25 + $0xc8] sm:$0xff] %v503_v52  ;;  %753 = vst [vmem:[%s1632_s25 + $0x1c8] sm:$0xff] %v663_v53  ;;  %v498_v56 = vadd.f32 %v1626_v16, %v497_v54  ;;  %v658_v57 = vadd.f32 %v1626_v16, %v657_v55 }
 0x15e   : > { %v1049_v58 = vpop.f32.mrf.mxu0  ;;  %v1097_v59 = vpop.f32.mrf.mxu1 }
 0x15f   : > { %720 = vst [vmem:[%s1632_s25 + $0xc0] sm:$0xff] %v498_v56  ;;  %752 = vst [vmem:[%s1632_s25 + $0x1c0] sm:$0xff] %v658_v57  ;;  %v513_v60 = vadd.f32 %v1049_v58, %v1626_v16  ;;  %v673_v61 = vadd.f32 %v1097_v59, %v1626_v16 }
 0x160   : > { %v507_v62 = vpop.f32.mrf.mxu0  ;;  %v667_v63 = vpop.f32.mrf.mxu1 }
 0x161   : > { %723 = vst [vmem:[%s1632_s25 + $0xd8] sm:$0xff] %v513_v60  ;;  %755 = vst [vmem:[%s1632_s25 + $0x1d8] sm:$0xff] %v673_v61  ;;  %v508_v0 = vadd.f32 %v1626_v16, %v507_v62  ;;  %v668_v1 = vadd.f32 %v1626_v16, %v667_v63 }
 0x162   : > { %v1052_v2 = vpop.f32.mrf.mxu0  ;;  %v1100_v3 = vpop.f32.mrf.mxu1 }
 0x163   : > { %722 = vst [vmem:[%s1632_s25 + $0xd0] sm:$0xff] %v508_v0  ;;  %754 = vst [vmem:[%s1632_s25 + $0x1d0] sm:$0xff] %v668_v1  ;;  %v523_v4 = vadd.f32 %v1052_v2, %v1626_v16  ;;  %v683_v5 = vadd.f32 %v1100_v3, %v1626_v16 }
 0x164   : > { %v517_v6 = vpop.f32.mrf.mxu0  ;;  %v677_v7 = vpop.f32.mrf.mxu1 }
 0x165   : > { %725 = vst [vmem:[%s1632_s25 + $0xe8] sm:$0xff] %v523_v4  ;;  %757 = vst [vmem:[%s1632_s25 + $0x1e8] sm:$0xff] %v683_v5  ;;  %v518_v8 = vadd.f32 %v1626_v16, %v517_v6  ;;  %v678_v9 = vadd.f32 %v1626_v16, %v677_v7 }
 0x166   : > { %v1055_v10 = vpop.f32.mrf.mxu0  ;;  %v1103_v11 = vpop.f32.mrf.mxu1 }
 0x167   : > { %724 = vst [vmem:[%s1632_s25 + $0xe0] sm:$0xff] %v518_v8  ;;  %756 = vst [vmem:[%s1632_s25 + $0x1e0] sm:$0xff] %v678_v9  ;;  %v533_v12 = vadd.f32 %v1055_v10, %v1626_v16  ;;  %v693_v13 = vadd.f32 %v1103_v11, %v1626_v16 }
 0x168   : > { %v527_v14 = vpop.f32.mrf.mxu0  ;;  %v687_v15 = vpop.f32.mrf.mxu1 }
 0x169   : > { %727 = vst [vmem:[%s1632_s25 + $0xf8] sm:$0xff] %v533_v12  ;;  %759 = vst [vmem:[%s1632_s25 + $0x1f8] sm:$0xff] %v693_v13  ;;  %v528_v17 = vadd.f32 %v1626_v16, %v527_v14  ;;  %v688_v18 = vadd.f32 %v1626_v16, %v687_v15 }
 0x16b   : > { %726 = vst [vmem:[%s1632_s25 + $0xf0] sm:$0xff] %v528_v17  ;;  %758 = vst [vmem:[%s1632_s25 + $0x1f0] sm:$0xff] %v688_v18 }
 0x16c   : > { %1296 = shalt.err (!%p1293_p5)
}
 0x16d   : > { %s1297_s17 = scalar_lea.hbm %s1760_s28, 8192  ;;  %s1301_s5 = scalar_lea.hbm %s1824_s3, 32768 }
 0x16e   : > { %p1298_p4 = scmp.ne.s32.totalorder %s1760_s28, %s1297_s17  ;;  %p1302_p9 = scmp.lt.s32.totalorder %s1760_s28, %s1824_s3 }
 0x16f   : > { %p1303_p10 = scmp.lt.s32.totalorder %s1301_s5, %s1297_s17 }
 0x170   : > { %p1299_p6 = pnand %p1298_p4, %p1503_p11 }
 0x171   : > { %p1304_p12 = por %p1303_p10, %p1302_p9 }
 0x172   : > { %p1300_p7 = pneg %p1299_p6 }
 0x174   : > { %p1305_p1 = pnand %p1304_p12, %p1300_p7 }
 0x176   : > { %1308 = shalt.err (!%p1305_p1)
}
 0x177   : > { %s1390_s25 = smov 128   ;;  %s1391_s26 = smov 8  }
 0x178   : > { %1142 = dma.vmem_to_hbm [thread:$0]  (%p1503_p11), %s1762_s16, 8192, %s1760_s28, %s761_s29, %s1390_s25, %s1390_s25, %s1391_s26  }
 0x179 PF: > { %s1849_s30 = sld [smem:[#allocation11_spill]]  ;;  %p1159_p8 = scmp.ge.s32.totalorder %s1383_s19, 2 }
 0x17a   : > { %s1850_s23 = sld [smem:[#allocation13_spill]] }
 0x17f   : > { %s791_s15 = sand.u32 1, %s1849_s30  }
 0x180   : > { %p1851_p13 = scmp.ne.s32.totalorder %s1850_s23, 0  ;;  %s792_s6 = scalar_lea.sflag [#allocation4], %s791_s15 }
 0x182   : > { %p1153_p2 = pnand %p1159_p8, %p1851_p13 }
 0x184   : > { %p1154_p0 = pneg %p1153_p2 }
 0x186   : > { %1350 = dma.done.wait (%p1154_p0), %s792_s6, 8192  }
 0x187   : > { %1352 = vsyncadd (%p1154_p0), %s792_s6, 4294959104  ;;  %s20_s19 = sadd.s32 1, %s1383_s19   ;;  %s1852_s15 = sld [smem:[#allocation12_spill]] }
 0x188   : > { %p17_p3 = scmp.ge.s32.totalorder %s20_s19, 6   ;;  %s1853_s17 = sld [smem:[#allocation14_spill]] }
 0x189   : > { %s1854_s12 = smov %s1359_s13  ;;  %s1855_s13 = smov %s1363_s14 }
 0x18a   : > { %s1856_s14 = smov %s1520_s4  ;;  %s1857_s16 = smov %s1379_s18 }
 0x18b   : > { %s1858_s18 = smov %s1864_s8  ;;  %19 = sbr.rel (!%p17_p3) target bundleno = 10 (0xa), region = 81 }
 0x190   :  { %797 = vsyncpa [#allocation3], 1 }
 0x191   :  { %799 = vsyncpa [#allocation3 + $0x1], 1 }
 0x192   :  { %800 = vsyncpa [#allocation6], 1 }
 0x193   :  { %801 = vsyncpa [#allocation4], 1 }
 0x194   :  { %803 = vsyncpa [#allocation4 + $0x1], 1 }

</bundles_post_ra>
